<compile_context>
chip_gen: v7x
topology: tpu7x:2x2x1
jax: 0.10.0
libtpu: 0.0.40
codegen_flags: <defaults>
</compile_context>

<pallas_src>
import functools
import math

import jax
import jax.numpy as jnp
import numpy as np
from jax.experimental import pallas as pl
from jax.experimental.pallas import tpu as pltpu


def _softshrink(v, lbd):
    # F.relu(x - lbd) - F.relu(-(x + lbd))
    return jnp.maximum(v - lbd, 0.0) - jnp.maximum(-(v + lbd), 0.0)


def _iabn_kernel(x_ref, p_ref, o_ref, *, k, eps, inv_l, inv_lm1, s2_factor,
                 skip_adjust):
    # x_ref: (1, TC, L) block; p_ref: (TC, 4) packed params.
    x = x_ref[0].astype(jnp.float32)            # (TC, L)
    p = p_ref[...].astype(jnp.float32)          # (TC, 4)
    mu_b = p[:, 0:1]                            # (TC, 1)
    var_b = p[:, 1:2]
    w = p[:, 2:3]
    b = p[:, 3:4]

    # One-pass per-instance, per-channel unbiased var/mean over L.
    sum_x = jnp.sum(x, axis=-1, keepdims=True)          # (TC, 1)
    sum_x2 = jnp.sum(x * x, axis=-1, keepdims=True)     # (TC, 1)
    mu = sum_x * inv_l
    sigma2 = (sum_x2 - sum_x * mu) * inv_lm1

    if skip_adjust:
        # l <= skip_thres: fall back to batch (running) statistics.
        mu_adj = mu_b
        sigma2_adj = var_b
    else:
        # All adjustment math stays on tiny (TC, 1) tensors.
        s_mu = jnp.sqrt((var_b + eps) * inv_l)
        s_sigma2 = (var_b + eps) * s2_factor
        mu_adj = mu_b + _softshrink(mu - mu_b, k * s_mu)
        sigma2_adj = jnp.maximum(
            var_b + _softshrink(sigma2 - var_b, k * s_sigma2), 0.0)

    # Fold normalization + affine into per-channel scale/shift.
    scale = w * jax.lax.rsqrt(sigma2_adj + eps)          # (TC, 1)
    shift = b - mu_adj * scale                           # (TC, 1)
    o_ref[0] = (x * scale + shift).astype(o_ref.dtype)


def _pick_channel_tile(c, l, itemsize, override, budget_bytes):
    """Pick a channel-tile size TC such that c % TC == 0 and TC is either the
    full C or a multiple of the sublane packing, sized to keep an x block
    within `budget_bytes` (so 2-in + 2-out double-buffers fit in scoped VMEM
    on all generations, including v7x's 64 MiB)."""
    sublane = {4: 8, 2: 16, 1: 32}.get(itemsize, 8)
    if override is not None:
        if c % override != 0:
            raise ValueError("channel_tile must divide C")
        if override != c and override % sublane != 0:
            raise ValueError("channel_tile must be a multiple of the sublane "
                             "packing or equal to C")
        return override
    if c % sublane != 0:
        return c  # full-C block is always layout-legal
    max_tc = max(1, budget_bytes // (l * itemsize))
    candidates = [t for t in range(sublane, c + 1, sublane) if c % t == 0]
    fitting = [t for t in candidates if t <= max_tc]
    # Largest tile that fits the budget; if nothing fits (very long L), take
    # the smallest legal tile and let vmem_limit_bytes absorb it.
    return max(fitting) if fitting else min(candidates)


def iabn_forward(x, running_mean, running_var, weight, bias,
                 *, k=3.0, eps=1e-5, skip_thres=0, channel_tile=None,
                 block_budget_bytes=4 * 1024 * 1024,
                 vmem_limit_bytes=48 * 1024 * 1024):
    """Inference-mode InstanceAwareBatchNorm1d. x is (B, C, L)."""
    b, c, l = x.shape
    if l < 2:
        # unbiased variance needs l >= 2 (PyTorch would produce NaN here).
        raise ValueError("IABN requires sequence length >= 2")

    # Pack the four per-channel parameters into one (C, 4) f32 tensor.
    params = jnp.stack(
        [running_mean.astype(jnp.float32), running_var.astype(jnp.float32),
         weight.astype(jnp.float32), bias.astype(jnp.float32)], axis=-1)

    itemsize = jnp.dtype(x.dtype).itemsize
    tc = _pick_channel_tile(c, l, itemsize, channel_tile, block_budget_bytes)

    kernel = functools.partial(
        _iabn_kernel, k=float(k), eps=float(eps),
        inv_l=1.0 / l, inv_lm1=1.0 / (l - 1),
        s2_factor=math.sqrt(2.0 / (l - 1)),
        skip_adjust=(l <= skip_thres))

    # TODO(synk): very long L (block > VMEM even at TC = sublane) would need an
    # L-tiled two-pass reduction; not required for typical 1d feature lengths.
    out = pl.pallas_call(
        kernel,
        out_shape=jax.ShapeDtypeStruct((b, c, l), x.dtype),
        grid_spec=pltpu.PrefetchScalarGridSpec(
            num_scalar_prefetch=0,
            grid=(b, c // tc),
            in_specs=[
                pl.BlockSpec((1, tc, l), lambda i, j: (i, j, 0)),
                pl.BlockSpec((tc, 4), lambda i, j: (j, 0)),
            ],
            out_specs=pl.BlockSpec((1, tc, l), lambda i, j: (i, j, 0)),
        ),
        compiler_params=pltpu.CompilerParams(
            dimension_semantics=("parallel", "parallel"),
            vmem_limit_bytes=vmem_limit_bytes),
    )(x, params)
    return out


def iabn_reference(x, running_mean, running_var, weight, bias,
                   *, k=3.0, eps=1e-5, skip_thres=0):
    """Pure-JAX reference mirroring the PyTorch forward (eval mode)."""
    b, c, l = x.shape
    xf = x.astype(jnp.float32)
    mu = jnp.mean(xf, axis=2, keepdims=True)
    sigma2 = jnp.sum((xf - mu) ** 2, axis=2, keepdims=True) / (l - 1)
    mu_b = running_mean.reshape(1, c, 1).astype(jnp.float32)
    var_b = running_var.reshape(1, c, 1).astype(jnp.float32)
    if l <= skip_thres:
        mu_adj, sigma2_adj = mu_b, var_b
    else:
        s_mu = jnp.sqrt((var_b + eps) / l)
        s_sigma2 = (var_b + eps) * np.sqrt(2.0 / (l - 1))
        mu_adj = mu_b + _softshrink(mu - mu_b, k * s_mu)
        sigma2_adj = jnp.maximum(
            var_b + _softshrink(sigma2 - var_b, k * s_sigma2), 0.0)
    x_n = (xf - mu_adj) * jax.lax.rsqrt(sigma2_adj + eps)
    x_n = x_n * weight.reshape(1, c, 1) + bias.reshape(1, c, 1)
    return x_n.astype(x.dtype)


def _make_inputs(key, b, c, l):
    kx, km, kv = jax.random.split(key, 3)
    x = jax.random.normal(kx, (b, c, l), dtype=jnp.float32) * 2.0 + 0.5
    running_mean = jax.random.normal(km, (c,), dtype=jnp.float32) * 0.1
    running_var = jnp.abs(jax.random.normal(kv, (c,), dtype=jnp.float32)) + 0.5
    weight = 1.0 + 0.1 * jnp.arange(c, dtype=jnp.float32)
    bias = 0.05 * jnp.arange(c, dtype=jnp.float32)
    return x, running_mean, running_var, weight, bias


if __name__ == "__main__":
    key = jax.random.PRNGKey(0)
    k1, k2 = jax.random.split(key)

    # TODO(synk): conf.args.skip_thres and training-mode batch statistics come
    # from external state; eval mode with running stats is implemented, and
    # skip_thres is exposed as an argument.

    # Case 1: small shape (C < 8 -> full-C block), adjustment path.
    x, rm, rv, w, bi = _make_inputs(k1, 2, 4, 128)
    out1 = jax.block_until_ready(
        iabn_forward(x, rm, rv, w, bi, k=3.0, eps=1e-5, skip_thres=0))
    ref1 = iabn_reference(x, rm, rv, w, bi, k=3.0, eps=1e-5, skip_thres=0)
    assert out1.shape == x.shape
    assert jnp.allclose(out1, ref1, atol=1e-4, rtol=1e-4), "case1 mismatch"

    # Case 2: channel-tiled grid (C=16, TC=8) exercising the 2-D parallel grid.
    x2, rm2, rv2, w2, bi2 = _make_inputs(k2, 2, 16, 256)
    out2 = jax.block_until_ready(
        iabn_forward(x2, rm2, rv2, w2, bi2, k=3.0, eps=1e-5, skip_thres=0,
                     channel_tile=8))
    ref2 = iabn_reference(x2, rm2, rv2, w2, bi2, k=3.0, eps=1e-5, skip_thres=0)
    assert jnp.allclose(out2, ref2, atol=1e-4, rtol=1e-4), "case2 mismatch"

    # Case 3: l <= skip_thres -> fall back to running (batch) statistics.
    out3 = jax.block_until_ready(
        iabn_forward(x, rm, rv, w, bi, k=3.0, eps=1e-5, skip_thres=1024))
    ref3 = iabn_reference(x, rm, rv, w, bi, k=3.0, eps=1e-5, skip_thres=1024)
    assert jnp.allclose(out3, ref3, atol=1e-4, rtol=1e-4), "case3 mismatch"

    print("KERNEL_OK")
</pallas_src>

<mosaic_0001>
module attributes {stable_mosaic.version = 11 : i64} {
  func.func @_iabn_kernel(%arg0: i32, %arg1: i32, %arg2: memref<1x4x128xf32, #tpu.memory_space<vmem>>, %arg3: memref<4x4xf32, #tpu.memory_space<vmem>>, %arg4: memref<1x4x128xf32, #tpu.memory_space<vmem>>) attributes {dimension_semantics = [#tpu.dimension_semantics<parallel>, #tpu.dimension_semantics<parallel>], iteration_bounds = array<i64: 2, 1>, scalar_prefetch = 0 : i64, scratch_operands = 0 : i64, tpu.core_type = #tpu.core_type<tc>, window_params = [{transform_indices = @transform_0, window_bounds = array<i64: 1, 4, 128>}, {transform_indices = @transform_1, window_bounds = array<i64: 4, 4>}, {transform_indices = @transform_2, window_bounds = array<i64: 1, 4, 128>}]} {
    %c0 = arith.constant 0 : index
    %c0_0 = arith.constant 0 : index
    %c0_1 = arith.constant 0 : index
    %0 = vector.load %arg2[%c0, %c0_0, %c0_1] : memref<1x4x128xf32, #tpu.memory_space<vmem>>, vector<1x4x128xf32>
    %1 = vector.shape_cast %0 : vector<1x4x128xf32> to vector<4x128xf32>
    %c0_2 = arith.constant 0 : index
    %c0_3 = arith.constant 0 : index
    %2 = vector.load %arg3[%c0_2, %c0_3] : memref<4x4xf32, #tpu.memory_space<vmem>>, vector<4x4xf32>
    %3 = vector.extract_strided_slice %2 {offsets = [0, 0], sizes = [4, 1], strides = [1, 1]} : vector<4x4xf32> to vector<4x1xf32>
    %4 = vector.extract_strided_slice %2 {offsets = [0, 1], sizes = [4, 1], strides = [1, 1]} : vector<4x4xf32> to vector<4x1xf32>
    %5 = vector.extract_strided_slice %2 {offsets = [0, 2], sizes = [4, 1], strides = [1, 1]} : vector<4x4xf32> to vector<4x1xf32>
    %6 = vector.extract_strided_slice %2 {offsets = [0, 3], sizes = [4, 1], strides = [1, 1]} : vector<4x4xf32> to vector<4x1xf32>
    %cst = arith.constant dense<0.000000e+00> : vector<4xf32>
    %7 = vector.multi_reduction <add>, %1, %cst [1] : vector<4x128xf32> to vector<4xf32>
    %8 = vector.shape_cast %7 : vector<4xf32> to vector<4x1xf32>
    %9 = arith.mulf %1, %1 : vector<4x128xf32>
    %cst_4 = arith.constant dense<0.000000e+00> : vector<4xf32>
    %10 = vector.multi_reduction <add>, %9, %cst_4 [1] : vector<4x128xf32> to vector<4xf32>
    %11 = vector.shape_cast %10 : vector<4xf32> to vector<4x1xf32>
    %cst_5 = arith.constant 7.812500e-03 : f32
    %12 = vector.broadcast %cst_5 : f32 to vector<4x1xf32>
    %13 = arith.mulf %8, %12 : vector<4x1xf32>
    %14 = arith.mulf %8, %13 : vector<4x1xf32>
    %15 = arith.subf %11, %14 : vector<4x1xf32>
    %cst_6 = arith.constant 0.00787401571 : f32
    %16 = vector.broadcast %cst_6 : f32 to vector<4x1xf32>
    %17 = arith.mulf %15, %16 : vector<4x1xf32>
    %cst_7 = arith.constant 9.99999974E-6 : f32
    %18 = vector.broadcast %cst_7 : f32 to vector<4x1xf32>
    %19 = arith.addf %4, %18 : vector<4x1xf32>
    %cst_8 = arith.constant 7.812500e-03 : f32
    %20 = vector.broadcast %cst_8 : f32 to vector<4x1xf32>
    %21 = arith.mulf %19, %20 : vector<4x1xf32>
    %22 = math.sqrt %21 : vector<4x1xf32>
    %cst_9 = arith.constant 9.99999974E-6 : f32
    %23 = vector.broadcast %cst_9 : f32 to vector<4x1xf32>
    %24 = arith.addf %4, %23 : vector<4x1xf32>
    %cst_10 = arith.constant 0.125491157 : f32
    %25 = vector.broadcast %cst_10 : f32 to vector<4x1xf32>
    %26 = arith.mulf %24, %25 : vector<4x1xf32>
    %27 = arith.subf %13, %3 : vector<4x1xf32>
    %cst_11 = arith.constant 3.000000e+00 : f32
    %28 = vector.broadcast %cst_11 : f32 to vector<4x1xf32>
    %29 = arith.mulf %28, %22 : vector<4x1xf32>
    %30 = arith.subf %27, %29 : vector<4x1xf32>
    %cst_12 = arith.constant 0.000000e+00 : f32
    %31 = vector.broadcast %cst_12 : f32 to vector<4x1xf32>
    %32 = arith.maximumf %30, %31 : vector<4x1xf32>
    %33 = arith.addf %27, %29 : vector<4x1xf32>
    %cst_13 = arith.constant 0.000000e+00 : f32
    %34 = vector.broadcast %cst_13 : f32 to vector<4x1xf32>
    %35 = arith.subf %34, %33 : vector<4x1xf32>
    %cst_14 = arith.constant 0.000000e+00 : f32
    %36 = vector.broadcast %cst_14 : f32 to vector<4x1xf32>
    %37 = arith.maximumf %35, %36 : vector<4x1xf32>
    %38 = arith.subf %32, %37 : vector<4x1xf32>
    %39 = arith.addf %3, %38 : vector<4x1xf32>
    %40 = arith.subf %17, %4 : vector<4x1xf32>
    %cst_15 = arith.constant 3.000000e+00 : f32
    %41 = vector.broadcast %cst_15 : f32 to vector<4x1xf32>
    %42 = arith.mulf %41, %26 : vector<4x1xf32>
    %43 = arith.subf %40, %42 : vector<4x1xf32>
    %cst_16 = arith.constant 0.000000e+00 : f32
    %44 = vector.broadcast %cst_16 : f32 to vector<4x1xf32>
    %45 = arith.maximumf %43, %44 : vector<4x1xf32>
    %46 = arith.addf %40, %42 : vector<4x1xf32>
    %cst_17 = arith.constant 0.000000e+00 : f32
    %47 = vector.broadcast %cst_17 : f32 to vector<4x1xf32>
    %48 = arith.subf %47, %46 : vector<4x1xf32>
    %cst_18 = arith.constant 0.000000e+00 : f32
    %49 = vector.broadcast %cst_18 : f32 to vector<4x1xf32>
    %50 = arith.maximumf %48, %49 : vector<4x1xf32>
    %51 = arith.subf %45, %50 : vector<4x1xf32>
    %52 = arith.addf %4, %51 : vector<4x1xf32>
    %cst_19 = arith.constant 0.000000e+00 : f32
    %53 = vector.broadcast %cst_19 : f32 to vector<4x1xf32>
    %54 = arith.maximumf %52, %53 : vector<4x1xf32>
    %cst_20 = arith.constant 9.99999974E-6 : f32
    %55 = vector.broadcast %cst_20 : f32 to vector<4x1xf32>
    %56 = arith.addf %54, %55 : vector<4x1xf32>
    %57 = math.rsqrt %56 : vector<4x1xf32>
    %58 = arith.mulf %5, %57 : vector<4x1xf32>
    %59 = arith.mulf %39, %58 : vector<4x1xf32>
    %60 = arith.subf %6, %59 : vector<4x1xf32>
    %61 = vector.broadcast %58 : vector<4x1xf32> to vector<4x128xf32>
    %62 = arith.mulf %1, %61 : vector<4x128xf32>
    %63 = vector.broadcast %60 : vector<4x1xf32> to vector<4x128xf32>
    %64 = arith.addf %62, %63 : vector<4x128xf32>
    %c0_21 = arith.constant 0 : index
    %c0_22 = arith.constant 0 : index
    %c0_23 = arith.constant 0 : index
    %65 = vector.load %arg4[%c0_21, %c0_22, %c0_23] : memref<1x4x128xf32, #tpu.memory_space<vmem>>, vector<1x4x128xf32>
    %66 = vector.shape_cast %65 : vector<1x4x128xf32> to vector<4x128xf32>
    %67 = vector.shape_cast %64 : vector<4x128xf32> to vector<1x4x128xf32>
    tpu.vector_store %arg4[%c0_21, %c0_22, %c0_23], %67 {strides = array<i32>} : memref<1x4x128xf32, #tpu.memory_space<vmem>>, vector<1x4x128xf32>,
    return
  }
  func.func @transform_0(%arg0: i32, %arg1: i32) -> (i32, i32, i32) {
    %c0_i32 = arith.constant 0 : i32
    %c0_i32_0 = arith.constant 0 : i32
    return %arg0, %arg1, %c0_i32 : i32, i32, i32
  }
  func.func @transform_1(%arg0: i32, %arg1: i32) -> (i32, i32) {
    %c0_i32 = arith.constant 0 : i32
    %c0_i32_0 = arith.constant 0 : i32
    return %arg1, %c0_i32 : i32, i32
  }
  func.func @transform_2(%arg0: i32, %arg1: i32) -> (i32, i32, i32) {
    %c0_i32 = arith.constant 0 : i32
    %c0_i32_0 = arith.constant 0 : i32
    return %arg0, %arg1, %c0_i32 : i32, i32, i32
  }
}

</mosaic_0001>

<bundles_post_ra>
// kernel: tpu_custom_call.1
= control target key start
LH: loop header
LB: loop body
LE: loop exit
PB: predicated region body
PF: predicated region fallthrough
CT: control target
= control target key end

     0   :  { %7 = vsyncpa [#allocation3], 0  ;;  %s876_s0 = inlined_call_operand.hbm [shape: f32[2,4,128], index: 0, kind: input, shape index: {}]   ;;  %s877_s1 = inlined_call_operand.hbm [shape: f32[4,4], index: 1, kind: input, shape index: {}]   ;;  %s878_s2 = inlined_call_operand.hbm [shape: f32[2,4,128], index: 2, kind: output, shape index: {}]  }
   0x1   :  { %9 = vsyncpa [#allocation3 + $0x1], 0 }
   0x2   :  { %10 = vsyncpa [#allocation6], 0 }
   0x3   :  { %11 = vsyncpa [#allocation4], 0 }
   0x4   :  { %13 = vsyncpa [#allocation4 + $0x1], 0  ;;  %s650_s9 = smov 0   ;;  %s652_s10 = smov 0  }
   0x5   :  { %s654_s11 = smov 0   ;;  %s656_s12 = smov 0  }
   0x6   :  { %s658_s13 = smov 0   ;;  %s660_s14 = smov 0  }
   0x7 LB: > { %s379_s15 = sadd.s32 4294967295, %s624_s14   ;;  %s380_s16 = sadd.s32 4294967294, %s624_s14   ;;  %s624_s14 = sphi %s660_s14, %s19_s14   ;;  %s620_s13 = sphi %s658_s13, %s903_s13   ;;  %s616_s12 = sphi %s656_s12, %s902_s12   ;;  %s612_s11 = sphi %s654_s11, %s901_s11   ;;  %s608_s10 = sphi %s652_s10, %s900_s10   ;;  %s604_s9 = sphi %s650_s9, %s899_s9  }
   0x8   : > { %p53_p0 = scmp.ne.s32.totalorder %s608_s10, %s604_s9  ;;  %p684_p1 = scmp.eq.s32.totalorder %s379_s15, 0 }
   0x9   : > { %p688_p2 = scmp.eq.s32.totalorder %s379_s15, 1  ;;  %p111_p3 = scmp.eq.s32.totalorder %s380_s16, 1 }
   0xa   : > { %s883_s17 = scalar_select %p684_p1, 1, 0 }
   0xb   : > { %s884_s18 = scalar_select %p688_p2, 1, 0 }
   0xc   : > { %p694_p4 = por %p684_p1, %p53_p0  ;;  %p381_p5 = scmp.ge.s32.totalorder %s624_s14, 1 }
   0xd   : > { %p699_p6 = por %p111_p3, %p53_p0  ;;  %p118_p7 = scmp.lt.s32.totalorder %s624_s14, 3 }
   0xe   : > { %s885_s19 = scalar_select %p694_p4, 1, 0 }
   0xf   : > { %s886_s20 = scalar_select %p699_p6, 1, 0 }
  0x10   : > { %p704_p8 = pnand %p381_p5, %p118_p7  ;;  %s626_s22 = smov [#allocation5]  }
  0x11   : > { %s133_s23 = sshll.u32 %s626_s22, 4  ;;  %s31_s25 = sadd.s32 1, %s620_s13  ;;  %s134_s23 = int_to_ptr.vmem [resolvable:$true] %s133_s23 }
  0x12   : > { %s887_s21 = scalar_select %p704_p8, 1, 0 }
  0x13   : > { %p402_p10 = pneg %p704_p8  ;;  %s40_s26 = sadd.s32 1, %s612_s11 }
  0x14   : > { %p719_p12 = scmp.ge.s32.totalorder %s31_s25, 2  ;;  %s480_s30 = scalar_lea.hbm %s877_s1, 64 }
  0x15   : > { %p713_p11 = pnand %p402_p10, %p684_p1  ;;  %p481_p13 = scmp.ne.s32.totalorder %s877_s1, %s480_s30 }
  0x16   : > { %s889_s27 = scalar_select %p719_p12, 1, 0 }
  0x17   : > { %p482_p0 = pneg %p713_p11  ;;  %p487_p7 = scmp.lt.u32.totalorder %s480_s30, %s877_s1 }
  0x19   : > { %p483_p3 = pnand %p482_p0, %p481_p13 }
  0x1b   : > { %p484_p5 = pneg %p483_p3 }
  0x1d   : > { %p489_p10 = pnand %p487_p7, %p484_p5 }
  0x1f   : > { %492 = shalt.err (!%p489_p10)
}
  0x20   : > { %s493_s7 = scalar_lea.vmem %s134_s23, 64  ;;  %p501_p4 = scmp.lt.s32.totalorder %s134_s23, %s134_s23 }
  0x21   : > { %p494_p9 = scmp.ne.s32.totalorder %s134_s23, %s493_s7  ;;  %p502_p8 = scmp.lt.s32.totalorder %s493_s7, %s493_s7 }
  0x23   : > { %p496_p6 = pnand %p494_p9, %p482_p0  ;;  %p503_p2 = por %p502_p8, %p501_p4 }
  0x25   : > { %p497_p1 = pneg %p496_p6 }
  0x27   : > { %p504_p12 = pnand %p503_p2, %p497_p1 }
  0x29   : > { %507 = shalt.err (!%p504_p12)
}
  0x2a   : > { %405 = dma.hbm_to_vmem [thread:$0]  (!%p713_p11), %s877_s1, 64, %s134_s23, [#allocation6]  }
  0x2b   : > { %p890_p4 = scmp.ne.s32.totalorder %s889_s27, 0  ;;  %p47_p1 = scmp.ne.s32.totalorder %s612_s11, %s608_s10 }
  0x2c   : > { %p48_p2 = scmp.eq.s32.totalorder %s624_s14, 0  ;;  %p415_p6 = scmp.lt.s32.totalorder %s624_s14, 2 }
  0x2d   : > { %s905_s25 = smov (%p890_p4, %s31_s25), 0  ;;  %p891_p12 = scmp.ne.s32.totalorder %s884_s18, 0 }
  0x2e   : > { %s35_s16 = ssub.s32 %s620_s13, %s905_s25  ;;  %p49_p9 = por %p48_p2, %p47_p1 }
  0x2f   : > { %p38_p8 = scmp.eq.s32.totalorder %s35_s16, 0  ;;  %p751_p13 = por %p891_p12, %p47_p1 }
  0x30   : > { %s144_s24 = sand.u32 1, %s612_s11   ;;  %s385_s27 = sshll.u32 %s620_s13, 6 }
  0x31   : > { %s759_s28 = scalar_select %p38_p8, %s612_s11, %s40_s26  }
  0x32   : > { %s384_s23 = sshll.u32 %s144_s24, 2  ;;  %s765_s3 = scalar_lea.hbm %s876_s0, %s385_s27 }
  0x33   : > { %s148_s18 = scalar_lea.vmem [#allocation2], %s384_s23  ;;  %p769_p11 = pnand %p415_p6, %p49_p9 }
  0x34   : > { %s156_s4 = sshll.u32 %s148_s18, 4  ;;  %s145_s26 = scalar_lea.sflag [#allocation3], %s144_s24  ;;  %s767_s4 = int_to_ptr.vmem [resolvable:$true] %s156_s4 }
  0x35   : > { %s508_s6 = scalar_lea.hbm %s765_s3, 64  ;;  %p510_p3 = pneg %p769_p11 }
  0x36   : > { %p509_p0 = scmp.ne.s32.totalorder %s765_s3, %s508_s6  ;;  %s513_s15 = scalar_lea.hbm %s876_s0, 128 }
  0x37   : > { %p514_p10 = scmp.lt.u32.totalorder %s765_s3, %s876_s0  ;;  %p515_p4 = scmp.lt.u32.totalorder %s513_s15, %s508_s6 }
  0x38   : > { %p511_p5 = pnand %p510_p3, %p509_p0  ;;  %p517_p2 = scmp.lt.u32.totalorder %s508_s6, %s765_s3 }
  0x39   : > { %p516_p1 = por %p515_p4, %p514_p10 }
  0x3a   : > { %p512_p7 = pneg %p511_p5 }
  0x3b   : > { %p518_p6 = por %p517_p2, %p516_p1 }
  0x3d   : > { %p519_p8 = pnand %p518_p6, %p512_p7 }
  0x3f   : > { %522 = shalt.err (!%p519_p8)
}
  0x40   : > { %s523_s24 = scalar_lea.vmem %s767_s4, 64  ;;  %s627_s27 = smov [#allocation2]  }
  0x41   : > { %p524_p9 = scmp.ne.s32.totalorder %s767_s4, %s523_s24  ;;  %s528_s29 = sshll.u32 %s627_s27, 4  ;;  %s529_s29 = int_to_ptr.vmem [resolvable:$false] %s528_s29 }
  0x42   : > { %s530_s30 = scalar_lea.vmem %s529_s29, 128  ;;  %p531_p5 = scmp.lt.s32.totalorder %s767_s4, %s529_s29 }
  0x43   : > { %p526_p12 = pnand %p524_p9, %p510_p3  ;;  %p532_p10 = scmp.lt.s32.totalorder %s530_s30, %s523_s24 }
  0x45   : > { %p527_p0 = pneg %p526_p12  ;;  %p533_p4 = por %p532_p10, %p531_p5 }
  0x47   : > { %p534_p1 = pnand %p533_p4, %p527_p0 }
  0x49   : > { %537 = shalt.err (!%p534_p1)
}
  0x4a   : > { %409 = dma.hbm_to_vmem [thread:$0]  (!%p769_p11), %s765_s3, 64, %s767_s4, %s145_s26  }
  0x4b   : > { %p894_p7 = scmp.ne.s32.totalorder %s887_s21, 0 }
  0x4c   : > { %s801_s18 = sand.u32 (!%p894_p7), 1, %s608_s10   ;;  %p895_p3 = scmp.ne.s32.totalorder (!%p894_p7), %s885_s19, 0 }
  0x4d   : > { %165 = sbr.rel (%p894_p7) target bundleno = 762 (0x2fa), region = 28  ;;  %s387_s6 = sshll.u32 (!%p894_p7), %s801_s18, 2 }
  0x4e   : > { %s168_s7 = scalar_lea.sflag (!%p894_p7), [#allocation3], %s801_s18  ;;  %s171_s8 = scalar_lea.vmem (!%p894_p7), [#allocation2], %s387_s6 }
  0x54   : > { %591 = dma.done.wait (%p895_p3), %s168_s7, 64  }
  0x55   : > { %593 = vsyncadd (%p895_p3), %s168_s7, 4294967232  ;;  %p896_p11 = scmp.ne.s32.totalorder %s883_s17, 0 }
  0x57   : > { %595 = dma.done.wait (%p896_p11), [#allocation6], 64  }
  0x58   : > { %597 = vsyncadd (%p896_p11), [#allocation6], 4294967232  ;;  %vm198_vm0 = vcmask 1043456   ;;  %v815_v0 = vld [vmem:[%s171_s8] sm:$0xf]  ;;  %s628_s17 = smov 1  }
  0x59   : > { %v199_v1 = vsel %vm198_vm0, %v815_v0, 0.0  ;;  %v202_v2 = vmul.f32 %v815_v0, %v815_v0  ;;  %v197_v4 = vld [vmem:[#allocation5] sm:$0xf]  ;;  %s629_s19 = smov 127   ;;  %v630_v32 = vmov 2   ;;  %s631_s21 = smov 126  }
  0x5a   : > { %200 = vadd.xlane.f32.xlu0 %v199_v1  ;;  %v210_v5 = vadd.f32 1e-05, %v197_v4  ;;  %473 = vset.pattern.permute.xlu1 %v630_v32  ;;  %v632_v41 = vmov 3   ;;  %s633_s3 = smov 3   ;;  %s391_s4 = sshll.u32 %s616_s12, 6 }
  0x5b   : > { %v203_v3 = vsel %vm198_vm0, %v202_v2, 0.0  ;;  %475 = vset.pattern.permute.xlu0 %v632_v41  ;;  %s195_s5 = scalar_lea.vmem [#allocation7], %s387_s6  ;;  %s827_s23 = scalar_lea.hbm %s878_s2, %s391_s4 }
  0x5c   : > { %v219_v9 = vmul.f32 0.12549116, %v210_v5  ;;  %v211_v14 = vmul.f32 0.0078125, %v210_v5  ;;  %s287_s26 = sshll.u32 %s195_s5, 4  ;;  %s273_s24 = scalar_lea.sflag [#allocation4], %s801_s18  ;;  %s829_s26 = int_to_ptr.vmem [resolvable:$true] %s287_s26 }
  0x5d   : > { %s538_s12 = scalar_lea.vmem %s829_s26, 64  ;;  %s634_s27 = smov [#allocation7]  }
  0x5e   : > { %204 = vadd.xlane.f32.xlu0 %v203_v3  ;;  %v234_v12 = vmul.f32 3.0, %v219_v9  ;;  %476 = vrsqrt.f32 %v211_v14  ;;  %vm214_vm1 = vcmp.eq.f32.partialorder %v211_v14, inf  ;;  %v217_v27 = vand.u32 2147483648, %v211_v14  ;;  %p539_p2 = scmp.ne.s32.totalorder %s829_s26, %s538_s12  ;;  %s542_s29 = sshll.u32 %s634_s27, 4  ;;  %s543_s29 = int_to_ptr.vmem [resolvable:$false] %s542_s29 }
  0x5f   : > { %vm216_vm2 = vcmp.eq.f32.partialorder %v211_v14, 0.0  ;;  %s544_s30 = scalar_lea.vmem %s543_s29, 128  ;;  %p545_p9 = scmp.lt.s32.totalorder %s829_s26, %s543_s29 }
  0x60   : > { %p540_p6 = pnand %p539_p2, %p751_p13  ;;  %p546_p12 = scmp.lt.s32.totalorder %s544_s30, %s538_s12 }
  0x62   : > { %p541_p8 = pneg %p540_p6  ;;  %p547_p0 = por %p546_p12, %p545_p9 }
  0x64   : > { %p548_p5 = pnand %p547_p0, %p541_p8 }
  0x68   : > { %v477_v24 = vpop.eup %476 }
  0x69   : > { %v213_v26 = vmul.f32 %v477_v24, %v211_v14 }
  0x6b   : > { %v215_v28 = vsel %vm214_vm1, %v211_v14, %v213_v26 }
  0x6c   : > { %v218_v29 = vsel %vm216_vm2, %v217_v27, %v215_v28 }
  0x6d   : > { %v221_v31 = vmul.f32 3.0, %v218_v29 }
  0xe7   : > { %v201_v6 = vpop.xlane.xlu0 %200 }
  0xe8   : > { %v206_v7 = vmul.f32 0.0078125, %v201_v6 }
  0xea   : > { %v207_v8 = vmul.f32 %v206_v7, %v201_v6  ;;  %v220_v36 = vsub.f32 %v206_v7, %v197_v4 }
  0xeb   : > { %v205_v10 = vpop.xlane.xlu0 %204 }
  0xec   : > { %v208_v11 = vsub.f32 %v205_v10, %v207_v8 }
  0xee   : > { %v209_v13 = vmul.f32 0.007874016, %v208_v11 }
  0xf0   : > { %v233_v15 = vsub.f32 %v209_v13, %v197_v4 }
  0xf2   : > { %v235_v16 = vsub.f32 %v233_v15, %v234_v12  ;;  %v237_v17 = vadd.f32 %v234_v12, %v233_v15 }
  0xf4   : > { %v238_v18 = vsub.f32 0.0, %v237_v17  ;;  %v236_v19 = vmax.f32 %v235_v16, 0.0 }
  0xf6   : > { %v239_v20 = vmax.f32 %v238_v18, 0.0 }
  0xf8   : > { %v240_v21 = vsub.f32 %v236_v19, %v239_v20 }
  0xfa   : > { %v241_v22 = vadd.f32 %v240_v21, %v197_v4 }
  0xfc   : > { %v242_v23 = vmax.f32 %v241_v22, 0.0 }
  0xfe   : > { %v243_v25 = vadd.f32 1e-05, %v242_v23 }
 0x100   : > { %478 = vrsqrt.f32 %v243_v25 }
 0x10a   : > { %v479_v30 = vpop.eup %478 }
 0x10b   : > { %246 = vrot.lane.b32.xlu1 %v479_v30, %s628_s17 }
 0x10f   : > { %223 = vrot.lane.b32.xlu1 %v221_v31, %s629_s19 }
 0x17d   : > { %v247_v33 = vpop.permute.xlu1 %246 }
 0x17e   : > { %v249_v34 = vmul.f32 %v247_v33, %v197_v4 }
 0x180   : > { %251 = vrot.lane.b32.xlu0 %v249_v34, %s631_s21 }
 0x181   : > { %v224_v35 = vpop.permute.xlu1 %223 }
 0x182   : > { %v228_v37 = vadd.f32 %v224_v35, %v220_v36  ;;  %v226_v39 = vsub.f32 %v220_v36, %v224_v35 }
 0x184   : > { %v229_v38 = vsub.f32 0.0, %v228_v37  ;;  %v227_v42 = vmax.f32 %v226_v39, 0.0 }
 0x186   : > { %v230_v40 = vmax.f32 %v229_v38, 0.0 }
 0x188   : > { %v231_v43 = vsub.f32 %v227_v42, %v230_v40 }
 0x18a   : > { %v232_v44 = vadd.f32 %v231_v43, %v197_v4 }
 0x1f2   : > { %v252_v45 = vpop.permute.xlu0 %251 }
 0x1f3   : > { %v254_v46 = vmul.f32 %v252_v45, %v232_v44 }
 0x1f5   : > { %256 = vrot.lane.b32.xlu1 %v254_v46, %s633_s3 }
 0x1f9   : > { %261 = vperm.xlu1 %473, %v249_v34  }
 0x1fd   : > { %474 = vset.pattern.permute.xlu1 %v632_v41 }
 0x267   : > { %v257_v47 = vpop.permute.xlu1 %256 }
 0x268   : > { %v259_v48 = vsub.f32 %v197_v4, %v257_v47 }
 0x26a   : > { %267 = vperm.xlu1 %474, %v259_v48  }
 0x278   : > { %v262_v49 = vpop.permute.xlu1 %261 }
 0x279   : > { %v264_v50 = vmul.f32 %v262_v49, %v815_v0 }
 0x2e9   : > { %v268_v51 = vpop.permute.xlu1 %267 }
 0x2ea   : > { %v270_v52 = vadd.f32 %v268_v51, %v264_v50 }
 0x2ec   : > { %271 = vst [vmem:[%s195_s5] sm:$0xf] %v270_v52 }
 0x2ed   : > { %551 = shalt.err (!%p548_p5)
}
 0x2ee   : > { %s552_s18 = scalar_lea.hbm %s827_s23, 64  ;;  %s556_s8 = scalar_lea.hbm %s878_s2, 128 }
 0x2ef   : > { %p553_p10 = scmp.ne.s32.totalorder %s827_s23, %s552_s18  ;;  %p557_p7 = scmp.lt.u32.totalorder %s827_s23, %s878_s2 }
 0x2f0   : > { %p558_p3 = scmp.lt.u32.totalorder %s556_s8, %s552_s18  ;;  %p560_p2 = scmp.lt.u32.totalorder %s552_s18, %s827_s23 }
 0x2f1   : > { %p554_p4 = pnand %p553_p10, %p751_p13 }
 0x2f2   : > { %p559_p11 = por %p558_p3, %p557_p7 }
 0x2f3   : > { %p555_p1 = pneg %p554_p4 }
 0x2f4   : > { %p561_p6 = por %p560_p2, %p559_p11 }
 0x2f6   : > { %p562_p8 = pnand %p561_p6, %p555_p1 }
 0x2f8   : > { %565 = shalt.err (!%p562_p8)
}
 0x2f9   : > { %400 = dma.vmem_to_hbm [thread:$0]  (%p751_p13), %s829_s26, 64, %s827_s23, %s273_s24  }
 0x2fa PF: > { %s299_s21 = sand.u32 1, %s604_s9   ;;  %p897_p9 = scmp.ne.s32.totalorder %s886_s20, 0 }
 0x2fb   : > { %p898_p12 = scmp.ge.s32.totalorder %s624_s14, 2  ;;  %s300_s3 = scalar_lea.sflag [#allocation4], %s299_s21 }
 0x2fd   : > { %p411_p0 = pnand %p898_p12, %p897_p9 }
 0x2ff   : > { %599 = dma.done.wait (!%p411_p0), %s300_s3, 64  }
 0x300   : > { %601 = vsyncadd (!%p411_p0), %s300_s3, 4294967232  ;;  %s19_s14 = sadd.s32 1, %s624_s14   ;;  %s899_s9 = smov %s608_s10 }
 0x301   : > { %p16_p5 = scmp.ge.s32.totalorder %s19_s14, 4   ;;  %s900_s10 = smov %s612_s11 }
 0x302   : > { %s901_s11 = smov %s759_s28  ;;  %s902_s12 = smov %s620_s13 }
 0x303   : > { %s903_s13 = smov %s905_s25  ;;  %18 = sbr.rel (!%p16_p5) target bundleno = 7 (0x7), region = 78 }
 0x30a   :  { %305 = vsyncpa [#allocation3], 1 }
 0x30b   :  { %307 = vsyncpa [#allocation3 + $0x1], 1 }
 0x30c   :  { %308 = vsyncpa [#allocation6], 1 }
 0x30d   :  { %309 = vsyncpa [#allocation4], 1 }
 0x30e   :  { %311 = vsyncpa [#allocation4 + $0x1], 1 }

</bundles_post_ra>
